<compile_context>
chip_gen: v6e
topology: v6e:2x2x1
jax: 0.10.0
libtpu: 0.0.40
codegen_flags: <defaults>
</compile_context>

<pallas_src>
import functools

import jax
import jax.numpy as jnp
from jax.experimental import pallas as pl
from jax.experimental.pallas import tpu as pltpu

LANE = 128
SUBLANE_BF16 = 16


def _round_up(x, m):
    return ((x + m - 1) // m) * m


def _pad2(a, rows, cols):
    return jnp.pad(a, ((0, rows - a.shape[0]), (0, cols - a.shape[1])))


def vae_kernel(x_ref, eps_ref, we1_ref, whead_ref, wd1_ref, wd2_ref, ball_ref,
               xhat_ref, ml_ref, *, latent):
    f32, bf16 = jnp.float32, jnp.bfloat16
    HP = we1_ref.shape[1]
    HL = whead_ref.shape[1]          # round_up(2*latent, 128): packed [mean|logvar] width
    DP = wd2_ref.shape[1]

    # 128-aligned static views of the packed bias vector (zero runtime cost).
    b_e1 = ball_ref[:, 0:HP]
    b_head = ball_ref[:, HP:HP + HL]
    b_d1 = ball_ref[:, HP + HL:2 * HP + HL]
    b_d2 = ball_ref[:, 2 * HP + HL:2 * HP + HL + DP]

    # ---- encoder trunk: bf16 MXU operands, f32 accumulation ----
    x = x_ref[...].astype(bf16)                       # free VPU cast if x streamed as f32
    h = jnp.dot(x, we1_ref[...], preferred_element_type=f32) + b_e1
    h = jnp.maximum(h, 0.0)

    # ---- fused mean|logvar head: one lane-dense [TB, HL] matmul ----
    ml = jnp.dot(h.astype(bf16), whead_ref[...], preferred_element_type=f32) + b_head

    # ---- reparameterization (f32 VPU/EUP, v5e-safe) ----
    # logvar lives in lanes [latent, 2*latent); rotate it down to lane 0 on the XLU.
    logvar_at0 = pltpu.roll(ml, shift=HL - latent, axis=1)
    std_eps = jnp.exp(0.5 * logvar_at0) * eps_ref[...].astype(f32)
    lane = jax.lax.broadcasted_iota(jnp.int32, ml.shape, 1)
    # Mask lanes >= latent: garbage lives there (rolled-in means could overflow exp, and eps
    # padding may become nonzero if in-kernel RNG is ever used). Zero-padded w_d1 rows then
    # only ever see exact zeros in the padding lanes of z.
    z = ml + jnp.where(lane < latent, std_eps, 0.0)

    # ---- decoder ----
    hd = jnp.dot(z.astype(bf16), wd1_ref[...], preferred_element_type=f32) + b_d1
    hd = jnp.maximum(hd, 0.0)
    x_hat = jnp.dot(hd.astype(bf16), wd2_ref[...], preferred_element_type=f32) + b_d2

    xhat_ref[...] = x_hat.astype(xhat_ref.dtype)      # bf16 writeback (largest output stream)
    ml_ref[...] = ml                                  # f32 [mean|logvar] for KL-quality numerics


def pack_vae_params(params):
    """Pad/cast/fuse weights ONCE (not per forward): lane-aligned bf16 weights, a fused
    [w_mu|w_lv] head packed before padding, and one 128-aligned packed f32 bias vector."""
    d_in, hidden = params["w_e1"].shape
    latent = params["w_mu"].shape[1]
    DP, HP = _round_up(d_in, LANE), _round_up(hidden, LANE)
    HL = _round_up(2 * latent, LANE)                  # tight head width (128 for latent <= 64)
    bf16, f32 = jnp.bfloat16, jnp.float32

    w_head = jnp.concatenate([params["w_mu"], params["w_lv"]], axis=1)   # (H, 2L) pre-pad
    b_head = jnp.concatenate([params["b_mu"], params["b_lv"]], axis=1)
    b_all = jnp.concatenate([
        _pad2(params["b_e1"], 1, HP),
        _pad2(b_head, 1, HL),
        _pad2(params["b_d1"], 1, HP),
        _pad2(params["b_d2"], 1, DP),
    ], axis=1).astype(f32)

    return dict(
        w_e1=_pad2(params["w_e1"], DP, HP).astype(bf16),
        w_head=_pad2(w_head, HP, HL).astype(bf16),
        w_d1=_pad2(params["w_d1"], HL, HP).astype(bf16),  # zero rows >= latent absorb junk z lanes
        w_d2=_pad2(params["w_d2"], HP, DP).astype(bf16),
        b_all=b_all,
        dims=(d_in, hidden, latent),
    )


def vae_forward(x, packed, eps, *, block_b=512):
    """Fused VAE forward. Returns (x_hat [bf16], mean [f32], logvar [f32]) in original shapes."""
    d_in, hidden, latent = packed["dims"]
    B = x.shape[0]
    DP, HP = packed["w_e1"].shape
    HL = packed["w_head"].shape[1]
    f32, bf16 = jnp.float32, jnp.bfloat16

    weight_bytes = sum(int(packed[k].size) * packed[k].dtype.itemsize
                       for k in ("w_e1", "w_head", "w_d1", "w_d2", "b_all"))

    # Batch tile: large (amortizes ~0.35us/grid-step and reuses the VMEM-resident weights),
    # forced to a multiple of 16 (bf16 sublane packing), shrunk until the VMEM budget fits
    # v7x's 64 MiB per TC.
    TB = min(_round_up(block_b, SUBLANE_BF16), _round_up(B, SUBLANE_BF16))

    def vmem_footprint(tb):
        stream = 2 * tb * (4 * DP + 2 * HL + 2 * DP + 4 * HL)   # double-buffered x/eps/x_hat/ml
        interm = 4 * tb * (2 * HP + 3 * HL)                     # live f32 h/hd/ml/z (rough)
        return weight_bytes + stream + interm

    VMEM_BUDGET = 40 << 20        # conservative: headroom inside v7x's 64 MiB per TensorCore
    while TB > SUBLANE_BF16 and vmem_footprint(TB) > VMEM_BUDGET:
        TB = max(SUBLANE_BF16, _round_up(TB // 2, SUBLANE_BF16))

    BP = _round_up(B, TB)
    n_blocks = BP // TB

    # Skip the wrapper pad+cast pass over x when shapes already line up (stream f32, cast
    # to bf16 in-kernel); otherwise fold the cast into the unavoidable padding pass.
    if d_in % LANE == 0 and BP == B:
        x_in = x
    else:
        x_in = _pad2(x, BP, DP).astype(bf16)
    eps_in = _pad2(eps, BP, HL).astype(bf16)           # noise precision: bf16 is plenty

    def stream_spec(cols):
        return pl.BlockSpec((TB, cols), lambda i: (i, 0))

    # Whole-array, single VMEM copy for constants (no double-buffered per-step DMA).
    resident = pl.BlockSpec(memory_space=pltpu.MemorySpace.VMEM)

    grid_spec = pltpu.PrefetchScalarGridSpec(
        num_scalar_prefetch=0,
        grid=(n_blocks,),
        in_specs=[
            stream_spec(DP),        # x tile (pipelined)
            stream_spec(HL),        # eps tile (pipelined)
            resident,               # w_e1
            resident,               # fused [w_mu | w_lv]
            resident,               # w_d1
            resident,               # w_d2
            resident,               # packed biases
        ],
        out_specs=(
            stream_spec(DP),        # x_hat (bf16, lane-dense)
            stream_spec(HL),        # [mean | logvar] (f32, lane-dense)
        ),
    )

    flops = 2 * BP * (DP * HP + HP * HL + HL * HP + HP * DP)
    bytes_accessed = (int(x_in.size) * x_in.dtype.itemsize + int(eps_in.size) * 2
                      + weight_bytes + BP * DP * 2 + BP * HL * 4)
    cost = pl.CostEstimate(flops=int(flops), transcendentals=int(BP * HL),
                           bytes_accessed=int(bytes_accessed))

    # Explicit scoped-VMEM limit: v5e default is 16 MiB, v6e/v7x 32 MiB; stay under 64 MiB.
    vmem_limit = int(min(max(2 * vmem_footprint(TB), 32 << 20), 56 << 20))

    fn = pl.pallas_call(
        functools.partial(vae_kernel, latent=latent),
        out_shape=(
            jax.ShapeDtypeStruct((BP, DP), bf16),
            jax.ShapeDtypeStruct((BP, HL), f32),
        ),
        grid_spec=grid_spec,
        compiler_params=pltpu.CompilerParams(
            dimension_semantics=("parallel",),       # batch axis shards across both v7x TCs
            vmem_limit_bytes=vmem_limit,
        ),
        cost_estimate=cost,
    )

    x_hat_p, ml_p = fn(x_in, eps_in, packed["w_e1"], packed["w_head"],
                       packed["w_d1"], packed["w_d2"], packed["b_all"])

    x_hat = x_hat_p[:B, :d_in]                 # bf16
    mean = ml_p[:B, :latent]                   # f32
    logvar = ml_p[:B, latent:2 * latent]       # f32
    return x_hat, mean, logvar


def init_params(key, d_in, hidden, latent):
    ks = jax.random.split(key, 5)

    def lin(kw, fan_in, fan_out):
        w = jax.random.normal(kw, (fan_in, fan_out), jnp.float32) * (1.0 / jnp.sqrt(fan_in))
        b = jnp.zeros((1, fan_out), jnp.float32)
        return w, b

    w_e1, b_e1 = lin(ks[0], d_in, hidden)
    w_mu, b_mu = lin(ks[1], hidden, latent)
    w_lv, b_lv = lin(ks[2], hidden, latent)
    w_d1, b_d1 = lin(ks[3], latent, hidden)
    w_d2, b_d2 = lin(ks[4], hidden, d_in)
    return dict(w_e1=w_e1, b_e1=b_e1, w_mu=w_mu, b_mu=b_mu, w_lv=w_lv, b_lv=b_lv,
                w_d1=w_d1, b_d1=b_d1, w_d2=w_d2, b_d2=b_d2)


def reference_forward(x, params, eps):
    """Pure-JAX reference mirroring the kernel's bf16-operand / f32-accumulate math."""
    bf, f32 = jnp.bfloat16, jnp.float32
    eps = eps.astype(bf).astype(f32)           # kernel streams eps as bf16
    h = jnp.dot(x.astype(bf), params["w_e1"].astype(bf),
                preferred_element_type=f32) + params["b_e1"]
    h = jnp.maximum(h, 0.0)
    hb = h.astype(bf)
    mean = jnp.dot(hb, params["w_mu"].astype(bf), preferred_element_type=f32) + params["b_mu"]
    logvar = jnp.dot(hb, params["w_lv"].astype(bf), preferred_element_type=f32) + params["b_lv"]
    z = mean + jnp.exp(0.5 * logvar) * eps
    hd = jnp.dot(z.astype(bf), params["w_d1"].astype(bf),
                 preferred_element_type=f32) + params["b_d1"]
    hd = jnp.maximum(hd, 0.0)
    x_hat = jnp.dot(hd.astype(bf), params["w_d2"].astype(bf),
                    preferred_element_type=f32) + params["b_d2"]
    return x_hat, mean, logvar


if __name__ == "__main__":
    B, D_IN, HIDDEN, LATENT = 8, 64, 32, 16

    key = jax.random.PRNGKey(0)
    k_x, k_p, k_eps = jax.random.split(key, 3)

    x = jax.random.normal(k_x, (B, D_IN), jnp.float32)
    params = init_params(k_p, D_IN, HIDDEN, LATENT)
    eps = jax.random.normal(k_eps, (B, LATENT), jnp.float32)   # torch.randn_like(mean)

    packed = pack_vae_params(params)          # pad/cast/fuse the weights once, outside forward
    x_hat, mean, logvar = vae_forward(x, packed, eps)
    jax.block_until_ready((x_hat, mean, logvar))

    x_hat_r, mean_r, logvar_r = reference_forward(x, params, eps)
    assert x_hat.shape == (B, D_IN) and mean.shape == (B, LATENT) and logvar.shape == (B, LATENT)

    xh = x_hat.astype(jnp.float32)
    xh_r = x_hat_r.astype(jnp.bfloat16).astype(jnp.float32)    # kernel emits x_hat in bf16
    assert jnp.allclose(xh, xh_r, atol=5e-2, rtol=5e-2), float(jnp.max(jnp.abs(xh - xh_r)))
    assert jnp.allclose(mean, mean_r, atol=2e-3, rtol=2e-3), float(jnp.max(jnp.abs(mean - mean_r)))
    assert jnp.allclose(logvar, logvar_r, atol=2e-3, rtol=2e-3), float(jnp.max(jnp.abs(logvar - logvar_r)))

    print("KERNEL_OK")
</pallas_src>

<mosaic_0001>
module attributes {stable_mosaic.version = 11 : i64} {
  func.func @vae_kernel(%arg0: i32, %arg1: memref<16x128xbf16, #tpu.memory_space<vmem>>, %arg2: memref<16x128xbf16, #tpu.memory_space<vmem>>, %arg3: memref<128x128xbf16, #tpu.memory_space<vmem>>, %arg4: memref<128x128xbf16, #tpu.memory_space<vmem>>, %arg5: memref<128x128xbf16, #tpu.memory_space<vmem>>, %arg6: memref<128x128xbf16, #tpu.memory_space<vmem>>, %arg7: memref<1x512xf32, #tpu.memory_space<vmem>>, %arg8: memref<16x128xbf16, #tpu.memory_space<vmem>>, %arg9: memref<16x128xf32, #tpu.memory_space<vmem>>) attributes {dimension_semantics = [#tpu.dimension_semantics<parallel>], iteration_bounds = array<i64: 1>, scalar_prefetch = 0 : i64, scratch_operands = 0 : i64, tpu.core_type = #tpu.core_type<tc>, window_params = [{transform_indices = @transform_0, window_bounds = array<i64: 16, 128>}, {transform_indices = @transform_1, window_bounds = array<i64: 16, 128>}, {pipeline_mode = #tpu.pipeline_mode<synchronous>, transform_indices = @transform_2, window_bounds = array<i64: 128, 128>}, {pipeline_mode = #tpu.pipeline_mode<synchronous>, transform_indices = @transform_3, window_bounds = array<i64: 128, 128>}, {pipeline_mode = #tpu.pipeline_mode<synchronous>, transform_indices = @transform_4, window_bounds = array<i64: 128, 128>}, {pipeline_mode = #tpu.pipeline_mode<synchronous>, transform_indices = @transform_5, window_bounds = array<i64: 128, 128>}, {pipeline_mode = #tpu.pipeline_mode<synchronous>, transform_indices = @transform_6, window_bounds = array<i64: 1, 512>}, {transform_indices = @transform_7, window_bounds = array<i64: 16, 128>}, {transform_indices = @transform_8, window_bounds = array<i64: 16, 128>}]} {
    %c0 = arith.constant 0 : index
    %c0_0 = arith.constant 0 : index
    %0 = vector.load %arg7[%c0, %c0_0] : memref<1x512xf32, #tpu.memory_space<vmem>>, vector<1x128xf32>
    %c0_1 = arith.constant 0 : index
    %c128 = arith.constant 128 : index
    %1 = vector.load %arg7[%c0_1, %c128] : memref<1x512xf32, #tpu.memory_space<vmem>>, vector<1x128xf32>
    %c0_2 = arith.constant 0 : index
    %c256 = arith.constant 256 : index
    %2 = vector.load %arg7[%c0_2, %c256] : memref<1x512xf32, #tpu.memory_space<vmem>>, vector<1x128xf32>
    %c0_3 = arith.constant 0 : index
    %c384 = arith.constant 384 : index
    %3 = vector.load %arg7[%c0_3, %c384] : memref<1x512xf32, #tpu.memory_space<vmem>>, vector<1x128xf32>
    %c0_4 = arith.constant 0 : index
    %c0_5 = arith.constant 0 : index
    %4 = vector.load %arg1[%c0_4, %c0_5] : memref<16x128xbf16, #tpu.memory_space<vmem>>, vector<16x128xbf16>
    %c0_6 = arith.constant 0 : index
    %c0_7 = arith.constant 0 : index
    %5 = vector.load %arg3[%c0_6, %c0_7] : memref<128x128xbf16, #tpu.memory_space<vmem>>, vector<128x128xbf16>
    %cst = arith.constant dense<0.000000e+00> : vector<16x128xf32>
    %6 = tpu.matmul %4, %5, %cst {dimension_numbers = #tpu.dot_dimension_numbers<[1], [0], [0], [1], [0, 0, 1, 1], [], []>} : vector<16x128xbf16>, vector<128x128xbf16>, vector<16x128xf32> -> vector<16x128xf32>
    %7 = vector.broadcast %0 : vector<1x128xf32> to vector<16x128xf32>
    %8 = arith.addf %6, %7 : vector<16x128xf32>
    %cst_8 = arith.constant 0.000000e+00 : f32
    %9 = vector.broadcast %cst_8 : f32 to vector<16x128xf32>
    %10 = arith.maximumf %8, %9 : vector<16x128xf32>
    %11 = arith.truncf %10 : vector<16x128xf32> to vector<16x128xbf16>
    %c0_9 = arith.constant 0 : index
    %c0_10 = arith.constant 0 : index
    %12 = vector.load %arg4[%c0_9, %c0_10] : memref<128x128xbf16, #tpu.memory_space<vmem>>, vector<128x128xbf16>
    %cst_11 = arith.constant dense<0.000000e+00> : vector<16x128xf32>
    %13 = tpu.matmul %11, %12, %cst_11 {dimension_numbers = #tpu.dot_dimension_numbers<[1], [0], [0], [1], [0, 0, 1, 1], [], []>} : vector<16x128xbf16>, vector<128x128xbf16>, vector<16x128xf32> -> vector<16x128xf32>
    %14 = vector.broadcast %1 : vector<1x128xf32> to vector<16x128xf32>
    %15 = arith.addf %13, %14 : vector<16x128xf32>
    %c112_i32 = arith.constant 112 : i32
    %16 = tpu.dynamic_rotate %15 by %c112_i32 dim 1 : vector<16x128xf32>, i32 -> vector<16x128xf32>
    %cst_12 = arith.constant 5.000000e-01 : f32
    %17 = vector.broadcast %cst_12 : f32 to vector<16x128xf32>
    %18 = arith.mulf %17, %16 : vector<16x128xf32>
    %19 = math.exp %18 : vector<16x128xf32>
    %c0_13 = arith.constant 0 : index
    %c0_14 = arith.constant 0 : index
    %20 = vector.load %arg2[%c0_13, %c0_14] : memref<16x128xbf16, #tpu.memory_space<vmem>>, vector<16x128xbf16>
    %21 = arith.extf %20 : vector<16x128xbf16> to vector<16x128xf32>
    %22 = arith.mulf %19, %21 : vector<16x128xf32>
    %23 = tpu.iota {dimensions = array<i32: 1>} : vector<16x128xi32>
    %c16_i32 = arith.constant 16 : i32
    %24 = vector.broadcast %c16_i32 : i32 to vector<16x128xi32>
    %25 = arith.cmpi slt, %23, %24 : vector<16x128xi32>
    %cst_15 = arith.constant 0.000000e+00 : f32
    %26 = vector.broadcast %cst_15 : f32 to vector<16x128xf32>
    %27 = arith.select %25, %22, %26 : vector<16x128xi1>, vector<16x128xf32>
    %28 = arith.addf %15, %27 : vector<16x128xf32>
    %29 = arith.truncf %28 : vector<16x128xf32> to vector<16x128xbf16>
    %c0_16 = arith.constant 0 : index
    %c0_17 = arith.constant 0 : index
    %30 = vector.load %arg5[%c0_16, %c0_17] : memref<128x128xbf16, #tpu.memory_space<vmem>>, vector<128x128xbf16>
    %cst_18 = arith.constant dense<0.000000e+00> : vector<16x128xf32>
    %31 = tpu.matmul %29, %30, %cst_18 {dimension_numbers = #tpu.dot_dimension_numbers<[1], [0], [0], [1], [0, 0, 1, 1], [], []>} : vector<16x128xbf16>, vector<128x128xbf16>, vector<16x128xf32> -> vector<16x128xf32>
    %32 = vector.broadcast %2 : vector<1x128xf32> to vector<16x128xf32>
    %33 = arith.addf %31, %32 : vector<16x128xf32>
    %cst_19 = arith.constant 0.000000e+00 : f32
    %34 = vector.broadcast %cst_19 : f32 to vector<16x128xf32>
    %35 = arith.maximumf %33, %34 : vector<16x128xf32>
    %36 = arith.truncf %35 : vector<16x128xf32> to vector<16x128xbf16>
    %c0_20 = arith.constant 0 : index
    %c0_21 = arith.constant 0 : index
    %37 = vector.load %arg6[%c0_20, %c0_21] : memref<128x128xbf16, #tpu.memory_space<vmem>>, vector<128x128xbf16>
    %cst_22 = arith.constant dense<0.000000e+00> : vector<16x128xf32>
    %38 = tpu.matmul %36, %37, %cst_22 {dimension_numbers = #tpu.dot_dimension_numbers<[1], [0], [0], [1], [0, 0, 1, 1], [], []>} : vector<16x128xbf16>, vector<128x128xbf16>, vector<16x128xf32> -> vector<16x128xf32>
    %39 = vector.broadcast %3 : vector<1x128xf32> to vector<16x128xf32>
    %40 = arith.addf %38, %39 : vector<16x128xf32>
    %41 = arith.truncf %40 : vector<16x128xf32> to vector<16x128xbf16>
    %c0_23 = arith.constant 0 : index
    %c0_24 = arith.constant 0 : index
    %42 = vector.load %arg8[%c0_23, %c0_24] : memref<16x128xbf16, #tpu.memory_space<vmem>>, vector<16x128xbf16>
    tpu.vector_store %arg8[%c0_23, %c0_24], %41 {strides = array<i32>} : memref<16x128xbf16, #tpu.memory_space<vmem>>, vector<16x128xbf16>,
    %c0_25 = arith.constant 0 : index
    %c0_26 = arith.constant 0 : index
    %43 = vector.load %arg9[%c0_25, %c0_26] : memref<16x128xf32, #tpu.memory_space<vmem>>, vector<16x128xf32>
    tpu.vector_store %arg9[%c0_25, %c0_26], %15 {strides = array<i32>} : memref<16x128xf32, #tpu.memory_space<vmem>>, vector<16x128xf32>,
    return
  }
  func.func @transform_0(%arg0: i32) -> (i32, i32) {
    %c0_i32 = arith.constant 0 : i32
    %c0_i32_0 = arith.constant 0 : i32
    return %arg0, %c0_i32 : i32, i32
  }
  func.func @transform_1(%arg0: i32) -> (i32, i32) {
    %c0_i32 = arith.constant 0 : i32
    %c0_i32_0 = arith.constant 0 : i32
    return %arg0, %c0_i32 : i32, i32
  }
  func.func @transform_2(%arg0: i32) -> (i32, i32) {
    %c0_i32 = arith.constant 0 : i32
    %c0_i32_0 = arith.constant 0 : i32
    %c0_i32_1 = arith.constant 0 : i32
    return %c0_i32, %c0_i32_0 : i32, i32
  }
  func.func @transform_3(%arg0: i32) -> (i32, i32) {
    %c0_i32 = arith.constant 0 : i32
    %c0_i32_0 = arith.constant 0 : i32
    %c0_i32_1 = arith.constant 0 : i32
    return %c0_i32, %c0_i32_0 : i32, i32
  }
  func.func @transform_4(%arg0: i32) -> (i32, i32) {
    %c0_i32 = arith.constant 0 : i32
    %c0_i32_0 = arith.constant 0 : i32
    %c0_i32_1 = arith.constant 0 : i32
    return %c0_i32, %c0_i32_0 : i32, i32
  }
  func.func @transform_5(%arg0: i32) -> (i32, i32) {
    %c0_i32 = arith.constant 0 : i32
    %c0_i32_0 = arith.constant 0 : i32
    %c0_i32_1 = arith.constant 0 : i32
    return %c0_i32, %c0_i32_0 : i32, i32
  }
  func.func @transform_6(%arg0: i32) -> (i32, i32) {
    %c0_i32 = arith.constant 0 : i32
    %c0_i32_0 = arith.constant 0 : i32
    %c0_i32_1 = arith.constant 0 : i32
    return %c0_i32, %c0_i32_0 : i32, i32
  }
  func.func @transform_7(%arg0: i32) -> (i32, i32) {
    %c0_i32 = arith.constant 0 : i32
    %c0_i32_0 = arith.constant 0 : i32
    return %arg0, %c0_i32 : i32, i32
  }
  func.func @transform_8(%arg0: i32) -> (i32, i32) {
    %c0_i32 = arith.constant 0 : i32
    %c0_i32_0 = arith.constant 0 : i32
    return %arg0, %c0_i32 : i32, i32
  }
}

</mosaic_0001>

<bundles_post_ra>
// kernel: tpu_custom_call.1
= control target key start
LH: loop header
LB: loop body
LE: loop exit
PB: predicated region body
PF: predicated region fallthrough
CT: control target
= control target key end

     0   :  { %14 = vsyncpa [#allocation3], 0  ;;  %s1194_s0 = inlined_call_operand.hbm [shape: bf16[16,128], index: 0, kind: input, shape index: {}]   ;;  %s1195_s1 = inlined_call_operand.hbm [shape: bf16[16,128], index: 1, kind: input, shape index: {}]   ;;  %s1196_s2 = inlined_call_operand.hbm [shape: bf16[128,128], index: 2, kind: input, shape index: {}]   ;;  %s1197_s3 = inlined_call_operand.hbm [shape: bf16[128,128], index: 3, kind: input, shape index: {}]   ;;  %s1198_s4 = inlined_call_operand.hbm [shape: bf16[128,128], index: 4, kind: input, shape index: {}]   ;;  %s1199_s5 = inlined_call_operand.hbm [shape: bf16[128,128], index: 5, kind: input, shape index: {}]   ;;  %s1200_s6 = inlined_call_operand.vmem [shape: f32[1,512], index: 6, kind: input, shape index: {}]   ;;  %s1201_s7 = inlined_call_operand.hbm [shape: bf16[16,128], index: 7, kind: output, shape index: {0}]   ;;  %s1202_s8 = inlined_call_operand.hbm [shape: f32[16,128], index: 8, kind: output, shape index: {1}]  }
   0x1   :  { %15 = vsyncpa [#allocation6], 0 }
   0x2   :  { %16 = vsyncpa [#allocation9], 0 }
   0x3   :  { %17 = vsyncpa [#allocation12], 0 }
   0x4   :  { %18 = vsyncpa [#allocation4], 0 }
   0x5   :  { %19 = vsyncpa [#allocation15], 0  ;;  %s1037_s27 = smov [#allocation5]   ;;  %s1038_s29 = smov [#allocation8]  }
   0x6   :  { %s37_s28 = sshll.u32 %s1037_s27, 4  ;;  %s61_s30 = sshll.u32 %s1038_s29, 4  ;;  %s38_s28 = int_to_ptr.vmem [resolvable:$true] %s37_s28  ;;  %s62_s30 = int_to_ptr.vmem [resolvable:$true] %s61_s30 }
   0x7   :  { %s873_s9 = scalar_lea.vmem %s38_s28, 128  ;;  %p878_p1 = scmp.lt.s32.totalorder %s38_s28, %s38_s28 }
   0x8   :  { %p874_p0 = scmp.ne.s32.totalorder %s38_s28, %s873_s9  ;;  %p879_p2 = scmp.lt.s32.totalorder %s873_s9, %s873_s9 }
   0xa   :  { %p880_p3 = por %p879_p2, %p878_p1 }
   0xc   :  { %p881_p4 = pnand %p880_p3, %p874_p0 }
   0xe   :  { %884 = shalt.err (!%p881_p4)
}
   0xf   :  { %s1039_s10 = smov 64   ;;  %s1040_s11 = smov 4  }
  0x10   :  { %43 = dma.hbm_to_vmem [thread:$0]  %s1195_s1, 128, %s38_s28, [#allocation6], %s1039_s10, %s1039_s10, %s1040_s11  }
  0x11   :  { %s893_s14 = scalar_lea.vmem %s62_s30, 1024  ;;  %p898_p6 = scmp.lt.s32.totalorder %s62_s30, %s62_s30 }
  0x12   :  { %p894_p5 = scmp.ne.s32.totalorder %s62_s30, %s893_s14  ;;  %p899_p7 = scmp.lt.s32.totalorder %s893_s14, %s893_s14 }
  0x14   :  { %p900_p8 = por %p899_p7, %p898_p6 }
  0x16   :  { %p901_p9 = pnand %p900_p8, %p894_p5 }
  0x18   :  { %904 = shalt.err (!%p901_p9)
}
  0x19   :  { %67 = dma.hbm_to_vmem [thread:$0]  %s1197_s3, 1024, %s62_s30, [#allocation9], %s1039_s10, %s1039_s10, %s1040_s11  }
  0x1a   :  { %s1041_s17 = smov [#allocation2]   ;;  %s1042_s19 = smov [#allocation7]  }
  0x1b   :  { %s25_s18 = sshll.u32 %s1041_s17, 4  ;;  %s49_s20 = sshll.u32 %s1042_s19, 4  ;;  %s26_s18 = int_to_ptr.vmem [resolvable:$true] %s25_s18  ;;  %s50_s20 = int_to_ptr.vmem [resolvable:$true] %s49_s20 }
  0x1c   :  { %s913_s1 = scalar_lea.vmem %s26_s18, 128  ;;  %p918_p11 = scmp.lt.s32.totalorder %s26_s18, %s26_s18 }
  0x1d   :  { %p914_p10 = scmp.ne.s32.totalorder %s26_s18, %s913_s1  ;;  %p919_p12 = scmp.lt.s32.totalorder %s913_s1, %s913_s1 }
  0x1f   :  { %p920_p13 = por %p919_p12, %p918_p11 }
  0x21   :  { %p921_p0 = pnand %p920_p13, %p914_p10 }
  0x23   :  { %924 = shalt.err (!%p921_p0)
}
  0x24   :  { %31 = dma.hbm_to_vmem [thread:$0]  %s1194_s0, 128, %s26_s18, [#allocation3], %s1039_s10, %s1039_s10, %s1040_s11  }
  0x25   :  { %s933_s3 = scalar_lea.vmem %s50_s20, 1024  ;;  %p938_p2 = scmp.lt.s32.totalorder %s50_s20, %s50_s20 }
  0x26   :  { %p934_p1 = scmp.ne.s32.totalorder %s50_s20, %s933_s3  ;;  %p939_p3 = scmp.lt.s32.totalorder %s933_s3, %s933_s3 }
  0x28   :  { %p940_p4 = por %p939_p3, %p938_p2 }
  0x2a   :  { %p941_p5 = pnand %p940_p4, %p934_p1 }
  0x2c   :  { %944 = shalt.err (!%p941_p5)
}
  0x2d   :  { %55 = dma.hbm_to_vmem [thread:$0]  %s1196_s2, 1024, %s50_s20, [#allocation6], %s1039_s10, %s1039_s10, %s1040_s11  }
  0x2e   :  { %s1043_s25 = smov [#allocation10]   ;;  %s1044_s27 = smov [#allocation11]  }
  0x2f   :  { %s73_s26 = sshll.u32 %s1043_s25, 4  ;;  %s85_s28 = sshll.u32 %s1044_s27, 4  ;;  %s74_s26 = int_to_ptr.vmem [resolvable:$true] %s73_s26  ;;  %s86_s28 = int_to_ptr.vmem [resolvable:$true] %s85_s28 }
  0x30   :  { %s953_s0 = scalar_lea.vmem %s74_s26, 1024  ;;  %p958_p7 = scmp.lt.s32.totalorder %s74_s26, %s74_s26 }
  0x31   :  { %p954_p6 = scmp.ne.s32.totalorder %s74_s26, %s953_s0  ;;  %p959_p8 = scmp.lt.s32.totalorder %s953_s0, %s953_s0 }
  0x33   :  { %p960_p9 = por %p959_p8, %p958_p7 }
  0x35   :  { %p961_p10 = pnand %p960_p9, %p954_p6 }
  0x37   :  { %964 = shalt.err (!%p961_p10)
}
  0x38   :  { %79 = dma.hbm_to_vmem [thread:$0]  %s1198_s4, 1024, %s74_s26, [#allocation9], %s1039_s10, %s1039_s10, %s1040_s11  }
  0x39   :  { %s973_s2 = scalar_lea.vmem %s86_s28, 1024  ;;  %p978_p12 = scmp.lt.s32.totalorder %s86_s28, %s86_s28 }
  0x3a   :  { %p974_p11 = scmp.ne.s32.totalorder %s86_s28, %s973_s2  ;;  %p979_p13 = scmp.lt.s32.totalorder %s973_s2, %s973_s2 }
  0x3c   :  { %p980_p0 = por %p979_p13, %p978_p12 }
  0x3e   :  { %p981_p1 = pnand %p980_p0, %p974_p11 }
  0x40   :  { %984 = shalt.err (!%p981_p1)
}
  0x41   :  { %91 = dma.hbm_to_vmem [thread:$0]  %s1199_s5, 1024, %s86_s28, [#allocation12], %s1039_s10, %s1039_s10, %s1040_s11  }
  0x42   :  { %1025 = dma.done.wait [#allocation3], 128  }
  0x43   :  { %1026 = vsyncadd [#allocation3], 4294967168 }
  0x44   :  { %1027 = dma.done.wait [#allocation6], 1152  }
  0x45   :  { %1028 = vsyncadd [#allocation6], 4294966144 }
  0x46   :  { %1029 = dma.done.wait [#allocation9], 2048  }
  0x47   :  { %1030 = vsyncadd [#allocation9], 4294965248 }
  0x48   :  { %1031 = dma.done.wait [#allocation12], 1024  }
  0x49   :  { %1032 = vsyncadd [#allocation12], 4294966272  ;;  %v1045_v0 = vmov 0.0   ;;  %vm1046_vm0 = vmmov 0   ;;  %v828_v1 = vld [vmem:[#allocation7 + $0x38] sm:$0xff]   ;;  %v829_v2 = vld [vmem:[#allocation7 + $0x30] sm:$0xff]   ;;  %v366_v55 = vlaneseq }
  0x4a   :  { %733 = vmatprep.subr.bf16.mxu0 %v1045_v0  ;;  %749 = vmatprep.mubr.msk.bf16.mxu0 %vm1046_vm0, %v1045_v0  ;;  %v830_v3 = vld [vmem:[#allocation7 + $0x28] sm:$0xff]   ;;  %v837_v4 = vld [vmem:[#allocation8 + $0x38] sm:$0xff]   ;;  %v831_v5 = vld [vmem:[#allocation7 + $0x20] sm:$0xff]   ;;  %s1047_s15 = smov 112   ;;  %s1048_s18 = smov [#allocation14]  }
  0x4b   :  { %753 = vmatprep.subr.bf16.mxu1 %v1045_v0  ;;  %769 = vmatprep.mubr.msk.bf16.mxu1 %vm1046_vm0, %v1045_v0  ;;  %v838_v6 = vld [vmem:[#allocation8 + $0x30] sm:$0xff]   ;;  %v832_v7 = vld [vmem:[#allocation7 + $0x18] sm:$0xff]   ;;  %v839_v8 = vld [vmem:[#allocation8 + $0x28] sm:$0xff]   ;;  %v367_v57 = vand.u32 127, %v366_v55  ;;  %s628_s19 = sshll.u32 %s1048_s18, 4  ;;  %s629_s19 = int_to_ptr.vmem [resolvable:$true] %s628_s19 }
  0x4c   :  { %734 = vmatpush3.bf16.msra.mxu0 %v828_v1  ;;  %754 = vmatpush3.bf16.msra.mxu1 %v837_v4  ;;  %v833_v9 = vld [vmem:[#allocation7 + $0x10] sm:$0xff]   ;;  %v840_v10 = vld [vmem:[#allocation8 + $0x20] sm:$0xff]   ;;  %v834_v11 = vld [vmem:[#allocation7 + $0x8] sm:$0xff]   ;;  %s985_s20 = scalar_lea.vmem %s629_s19, 256  ;;  %p990_p3 = scmp.lt.s32.totalorder %s629_s19, %s629_s19 }
  0x4d   :  { %735 = vmatprep.subr.bf16.mxu0 %v1045_v0  ;;  %755 = vmatprep.subr.bf16.mxu1 %v1045_v0  ;;  %v841_v12 = vld [vmem:[#allocation8 + $0x18] sm:$0xff]   ;;  %v835_v13 = vld [vmem:[#allocation7] sm:$0xff]   ;;  %v836_v14 = vld [vmem:[#allocation2] sm:$0xff]   ;;  %vm368_vm1 = vcmp.lt.s32.totalorder %v367_v57, 16  ;;  %p986_p2 = scmp.ne.s32.totalorder %s629_s19, %s985_s20  ;;  %p991_p4 = scmp.lt.s32.totalorder %s985_s20, %s985_s20 }
  0x4e   :  { %v842_v15 = vld [vmem:[#allocation8 + $0x10] sm:$0xff]   ;;  %v843_v16 = vld [vmem:[#allocation8 + $0x8] sm:$0xff]   ;;  %v844_v17 = vld [vmem:[#allocation8] sm:$0xff]  }
  0x4f   :  { %v647_v18 = vld [vmem:[%s1200_s6] ss:$0 sm:$0xff]  ;;  %v845_v28 = vld [vmem:[#allocation10 + $0x38] sm:$0xff]   ;;  %v847_v30 = vld [vmem:[#allocation10 + $0x28] sm:$0xff]   ;;  %p992_p5 = por %p991_p4, %p990_p3 }
  0x50   :  { %736 = vmatpush3.bf16.msra.mxu0 %v829_v2  ;;  %756 = vmatpush3.bf16.msra.mxu1 %v838_v6  ;;  %v846_v29 = vld [vmem:[#allocation10 + $0x30] sm:$0xff]   ;;  %v848_v32 = vld [vmem:[#allocation10 + $0x20] sm:$0xff]   ;;  %v849_v34 = vld [vmem:[#allocation10 + $0x18] sm:$0xff]  }
  0x51   :  { %737 = vmatprep.subr.bf16.mxu0 %v1045_v0  ;;  %757 = vmatprep.subr.bf16.mxu1 %v1045_v0  ;;  %v657_v31 = vld [vmem:[%s1200_s6 + $0x1] ss:$0 sm:$0xff]  ;;  %v851_v41 = vld [vmem:[#allocation10 + $0x8] sm:$0xff]   ;;  %v852_v42 = vld [vmem:[#allocation10] sm:$0xff]   ;;  %p993_p6 = pnand %p992_p5, %p986_p2 }
  0x52   :  { %v850_v38 = vld [vmem:[#allocation10 + $0x10] sm:$0xff]   ;;  %v853_v43 = vld [vmem:[#allocation11 + $0x38] sm:$0xff]   ;;  %v855_v45 = vld [vmem:[#allocation11 + $0x28] sm:$0xff]  }
  0x53   :  { %v854_v44 = vld [vmem:[#allocation11 + $0x30] sm:$0xff]   ;;  %v856_v46 = vld [vmem:[#allocation11 + $0x20] sm:$0xff]   ;;  %v857_v47 = vld [vmem:[#allocation11 + $0x18] sm:$0xff]  }
  0x54   :  { %738 = vmatpush3.bf16.msra.mxu0 %v830_v3  ;;  %758 = vmatpush3.bf16.msra.mxu1 %v839_v8  ;;  %v689_v54 = vld [vmem:[#allocation5] sm:$0xff]   ;;  %v859_v6 = vld [vmem:[#allocation11 + $0x8] sm:$0xff]   ;;  %v666_v8 = vld [vmem:[%s1200_s6 + $0x2] ss:$0 sm:$0xff] }
  0x55   :  { %739 = vmatprep.subr.bf16.mxu0 %v1045_v0  ;;  %759 = vmatprep.subr.bf16.mxu1 %v1045_v0  ;;  %v690_v56 = vunpack.c.l.bf16 %v689_v54  ;;  %v691_v59 = vunpack.c.h.bf16 %v689_v54 }
  0x58   :  { %740 = vmatpush3.bf16.msra.mxu0 %v831_v5  ;;  %760 = vmatpush3.bf16.msra.mxu1 %v840_v10  ;;  %v858_v5 = vld [vmem:[#allocation11 + $0x10] sm:$0xff]  }
  0x59   :  { %741 = vmatprep.subr.bf16.mxu0 %v1045_v0  ;;  %761 = vmatprep.subr.bf16.mxu1 %v1045_v0 }
  0x5c   :  { %742 = vmatpush3.bf16.msra.mxu0 %v832_v7  ;;  %762 = vmatpush3.bf16.msra.mxu1 %v841_v12  ;;  %v860_v7 = vld [vmem:[#allocation11] sm:$0xff]  }
  0x5d   :  { %743 = vmatprep.subr.bf16.mxu0 %v1045_v0  ;;  %763 = vmatprep.subr.bf16.mxu1 %v1045_v0 }
  0x60   :  { %744 = vmatpush3.bf16.msra.mxu0 %v833_v9  ;;  %764 = vmatpush3.bf16.msra.mxu1 %v842_v15 }
  0x61   :  { %745 = vmatprep.subr.bf16.mxu0 %v1045_v0  ;;  %765 = vmatprep.subr.bf16.mxu1 %v1045_v0 }
  0x64   :  { %746 = vmatpush3.bf16.msra.mxu0 %v834_v11  ;;  %766 = vmatpush3.bf16.msra.mxu1 %v843_v16 }
  0x65   :  { %747 = vmatprep.subr.bf16.mxu0 %v1045_v0  ;;  %767 = vmatprep.subr.bf16.mxu1 %v1045_v0 }
  0x68   :  { %748 = vmatpush3.bf16.msra.mxu0 %v835_v13  ;;  %768 = vmatpush3.bf16.msra.mxu1 %v844_v17 }
  0x69   :  { %773 = vmatprep.subr.bf16.mxu0 %v1045_v0  ;;  %793 = vmatprep.subr.bf16.mxu1 %v1045_v0 }
  0x6b   :  { %750 = vmatmul.mubr.bf16.vlgmr.msra.gmra.mxu0 %v836_v14 }
  0x6c   :  { %789 = vmatprep.mubr.msk.bf16.mxu0 %vm1046_vm0, %v1045_v0  ;;  %774 = vmatpush3.bf16.msra.mxu0 %v845_v28 }
  0x6d   :  { %775 = vmatprep.subr.bf16.mxu0 %v1045_v0 }
  0x70   :  { %776 = vmatpush3.bf16.msra.mxu0 %v846_v29 }
  0x71   :  { %777 = vmatprep.subr.bf16.mxu0 %v1045_v0 }
  0x74   :  { %778 = vmatpush3.bf16.msra.mxu0 %v847_v30 }
  0x75   :  { %779 = vmatprep.subr.bf16.mxu0 %v1045_v0 }
  0x78   :  { %780 = vmatpush3.bf16.msra.mxu0 %v848_v32 }
  0x79   :  { %781 = vmatprep.subr.bf16.mxu0 %v1045_v0 }
  0x7c   :  { %782 = vmatpush3.bf16.msra.mxu0 %v849_v34 }
  0x7d   :  { %783 = vmatprep.subr.bf16.mxu0 %v1045_v0 }
  0x80   :  { %784 = vmatpush3.bf16.msra.mxu0 %v850_v38 }
  0x81   :  { %785 = vmatprep.subr.bf16.mxu0 %v1045_v0 }
  0x84   :  { %786 = vmatpush3.bf16.msra.mxu0 %v851_v41 }
  0x85   :  { %787 = vmatprep.subr.bf16.mxu0 %v1045_v0 }
  0x88   :  { %788 = vmatpush3.bf16.msra.mxu0 %v852_v42 }
 0x12b   :  { %v229_v19 = vpop.f32.mrf.mxu0 }
 0x12c   :  { %v230_v21 = vadd.f32 %v647_v18, %v229_v19 }
 0x12d   :  { %v751_v20 = vpop.f32.mrf.mxu0 }
 0x12e   :  { %v236_v25 = vmax.f32 %v230_v21, 0.0 }
 0x12f   :  { %v232_v22 = vpop.f32.mrf.mxu0 }
 0x130   :  { %v233_v23 = vadd.f32 %v647_v18, %v232_v22 }
 0x131   :  { %v752_v24 = vpop.f32.mrf.mxu0 }
 0x132   :  { %v237_v26 = vmax.f32 %v233_v23, 0.0 }
 0x134   :  { %v238_v27 = vpack.c.bf16 %v237_v26, %v236_v25 }
 0x136   :  { %770 = vmatmul.mubr.bf16.vlgmr.msra.gmra.mxu1 %v238_v27 }
 0x137   :  { %809 = vmatprep.mubr.msk.bf16.mxu1 %vm1046_vm0, %v1045_v0  ;;  %794 = vmatpush3.bf16.msra.mxu1 %v853_v43 }
 0x138   :  { %795 = vmatprep.subr.bf16.mxu1 %v1045_v0 }
 0x13b   :  { %796 = vmatpush3.bf16.msra.mxu1 %v854_v44 }
 0x13c   :  { %797 = vmatprep.subr.bf16.mxu1 %v1045_v0 }
 0x13f   :  { %798 = vmatpush3.bf16.msra.mxu1 %v855_v45 }
 0x140   :  { %799 = vmatprep.subr.bf16.mxu1 %v1045_v0 }
 0x143   :  { %800 = vmatpush3.bf16.msra.mxu1 %v856_v46 }
 0x144   :  { %801 = vmatprep.subr.bf16.mxu1 %v1045_v0 }
 0x147   :  { %802 = vmatpush3.bf16.msra.mxu1 %v857_v47 }
 0x148   :  { %803 = vmatprep.subr.bf16.mxu1 %v1045_v0 }
 0x14b   :  { %804 = vmatpush3.bf16.msra.mxu1 %v858_v5 }
 0x14c   :  { %805 = vmatprep.subr.bf16.mxu1 %v1045_v0 }
 0x14f   :  { %806 = vmatpush3.bf16.msra.mxu1 %v859_v6 }
 0x150   :  { %807 = vmatprep.subr.bf16.mxu1 %v1045_v0 }
 0x153   :  { %808 = vmatpush3.bf16.msra.mxu1 %v860_v7 }
 0x1f6   :  { %v343_v33 = vpop.f32.mrf.mxu1 }
 0x1f7   :  { %v344_v35 = vadd.f32 %v657_v31, %v343_v33 }
 0x1f8   :  { %v771_v36 = vpop.f32.mrf.mxu1 }
 0x1f9   :  { %609 = vst [vmem:[#allocation14] sm:$0xff] %v344_v35  ;;  %350 = vrot.lane.b32.xlu0 %v344_v35, %s1047_s15 }
 0x1fa   :  { %v346_v37 = vpop.f32.mrf.mxu1 }
 0x1fb   :  { %v347_v39 = vadd.f32 %v657_v31, %v346_v37 }
 0x1fc   :  { %v772_v40 = vpop.f32.mrf.mxu1 }
 0x1fd   :  { %610 = vst [vmem:[#allocation14 + $0x8] sm:$0xff] %v347_v39  ;;  %352 = vrot.lane.b32.xlu0 %v347_v39, %s1047_s15 }
 0x26b   :  { %v351_v48 = vpop.permute.xlu0 %350 }
 0x26c   :  { %v354_v49 = vmul.f32 0.5, %v351_v48 }
 0x26e   :  { %v356_v50 = vmul.f32 1.442695, %v354_v49 }
 0x26f   :  { %v353_v51 = vpop.permute.xlu0 %352 }
 0x270   :  { %861 = vpow2.f32 %v356_v50  ;;  %v355_v52 = vmul.f32 0.5, %v353_v51 }
 0x272   :  { %v358_v53 = vmul.f32 1.442695, %v355_v52 }
 0x274   :  { %863 = vpow2.f32 %v358_v53 }
 0x27d   :  { %v862_v58 = vpop.eup %861 }
 0x27e   :  { %v364_v60 = vmul.f32 %v862_v58, %v690_v56 }
 0x280   :  { %v369_v63 = vsel %vm368_vm1, %v364_v60, 0.0 }
 0x281   :  { %v864_v61 = vpop.eup %863  ;;  %v371_v2 = vadd.f32 %v369_v63, %v344_v35 }
 0x282   :  { %v365_v62 = vmul.f32 %v864_v61, %v691_v59 }
 0x284   :  { %v370_v1 = vsel %vm368_vm1, %v365_v62, 0.0 }
 0x285   :  { %v372_v3 = vadd.f32 %v370_v1, %v347_v39 }
 0x287   :  { %v373_v4 = vpack.c.bf16 %v372_v3, %v371_v2 }
 0x289   :  { %790 = vmatmul.mubr.bf16.vlgmr.msra.gmra.mxu0 %v373_v4 }
 0x349   :  { %v478_v9 = vpop.f32.mrf.mxu0 }
 0x34a   :  { %v479_v11 = vadd.f32 %v666_v8, %v478_v9 }
 0x34b   :  { %v791_v10 = vpop.f32.mrf.mxu0 }
 0x34c   :  { %v485_v15 = vmax.f32 %v479_v11, 0.0 }
 0x34d   :  { %v481_v12 = vpop.f32.mrf.mxu0 }
 0x34e   :  { %v482_v13 = vadd.f32 %v666_v8, %v481_v12 }
 0x34f   :  { %v792_v14 = vpop.f32.mrf.mxu0 }
 0x350   :  { %v486_v16 = vmax.f32 %v482_v13, 0.0 }
 0x352   :  { %v487_v17 = vpack.c.bf16 %v486_v16, %v485_v15 }
 0x354   :  { %810 = vmatmul.mubr.bf16.vlgmr.msra.gmra.mxu1 %v487_v17 }
 0x355   :  { %996 = shalt.err (!%p993_p6)
}
 0x356   :  { %s1049_s1 = smov 128   ;;  %s1050_s21 = smov 8   ;;  %v675_v18 = vld [vmem:[%s1200_s6 + $0x3] ss:$0 sm:$0xff] }
 0x357   :  { %634 = dma.vmem_to_hbm [thread:$0]  %s629_s19, 256, %s1202_s8, [#allocation15], %s1049_s1, %s1049_s1, %s1050_s21  }
 0x358   :  { %s1051_s25 = smov [#allocation13]  }
 0x359   :  { %s616_s26 = sshll.u32 %s1051_s25, 4  ;;  %s617_s26 = int_to_ptr.vmem [resolvable:$true] %s616_s26 }
 0x35a   :  { %s1005_s27 = scalar_lea.vmem %s617_s26, 128  ;;  %p1010_p8 = scmp.lt.s32.totalorder %s617_s26, %s617_s26 }
 0x35b   :  { %p1006_p7 = scmp.ne.s32.totalorder %s617_s26, %s1005_s27  ;;  %p1011_p9 = scmp.lt.s32.totalorder %s1005_s27, %s1005_s27 }
 0x35d   :  { %p1012_p10 = por %p1011_p9, %p1010_p8 }
 0x35f   :  { %p1013_p11 = pnand %p1012_p10, %p1006_p7 }
 0x414   :  { %v592_v0 = vpop.f32.mrf.mxu1 }
 0x415   :  { %v593_v21 = vadd.f32 %v675_v18, %v592_v0 }
 0x416   :  { %v811_v19 = vpop.f32.mrf.mxu1 }
 0x418   :  { %v595_v20 = vpop.f32.mrf.mxu1 }
 0x419   :  { %v596_v22 = vadd.f32 %v675_v18, %v595_v20 }
 0x41a   :  { %v812_v23 = vpop.f32.mrf.mxu1 }
 0x41b   :  { %v695_v24 = vpack.c.bf16 %v596_v22, %v593_v21 }
 0x41d   :  { %696 = vst [vmem:[#allocation13] sm:$0xff] %v695_v24  }
 0x41e   :  { %1016 = shalt.err (!%p1013_p11)
}
 0x41f   :  { %622 = dma.vmem_to_hbm [thread:$0]  %s617_s26, 128, %s1201_s7, [#allocation4], %s1039_s10, %s1039_s10, %s1040_s11  }
 0x420   :  { %1033 = dma.done.wait [#allocation4], 128  }
 0x421   :  { %1034 = vsyncadd [#allocation4], 4294967168 }
 0x422   :  { %1035 = dma.done.wait [#allocation15], 256  }
 0x423   :  { %1036 = vsyncadd [#allocation15], 4294967040 }
 0x424   :  { %641 = vsyncpa [#allocation3], 1 }
 0x425   :  { %642 = vsyncpa [#allocation6], 1 }
 0x426   :  { %643 = vsyncpa [#allocation9], 1 }
 0x427   :  { %644 = vsyncpa [#allocation12], 1 }
 0x428   :  { %645 = vsyncpa [#allocation4], 1 }
 0x429   :  { %646 = vsyncpa [#allocation15], 1 }

</bundles_post_ra>
